<compile_context>
chip_gen: v5e
topology: v5e:2x2
jax: 0.10.0
libtpu: 0.0.40
codegen_flags: <defaults>
</compile_context>

<pallas_src>
import functools

import jax
import jax.numpy as jnp
from jax.experimental import pallas as pl
from jax.experimental.pallas import tpu as pltpu

LANE = 128      # TPU lane width; hidden/contraction dims are padded to this.
TM_MAX = 512    # Batch tile cap (sweep 256/512/1024 on real workloads).


def _round_up(n, m):
    return ((n + m - 1) // m) * m


def _mlp_fused_kernel(*refs, num_layers):
    """refs = (x_ref, w0, b0, w1, b1, ..., o_ref).

    Chains `y = x @ W + b` (+ ReLU for all but the last layer) entirely in
    VMEM/vregs; only the final layer's (tm, out_size) result is stored.
    """
    x_ref = refs[0]
    o_ref = refs[-1]
    wb_refs = refs[1:-1]

    # x arrives at its true (unpadded) feature width in f32; cast to bf16
    # on the VPU for the MXU.  Accumulation / bias / ReLU stay f32.
    h = x_ref[...].astype(jnp.bfloat16)
    for layer in range(num_layers):
        w = wb_refs[2 * layer][...]       # bf16 [d_in(_p), d_out(_p)]
        b = wb_refs[2 * layer + 1][...]   # f32  [1, d_out(_p)]
        y = jnp.dot(h, w, preferred_element_type=jnp.float32) + b
        if layer < num_layers - 1:
            # Hidden layer: ReLU in f32, back to bf16 for the next MXU pass.
            h = jnp.maximum(y, 0.0).astype(jnp.bfloat16)
        else:
            o_ref[...] = y                # final layer: no activation, f32 out


def init_mlp_params(key, h_sizes, out_size):
    """Parameters matching nn.Linear init.

    hidden[k]: Linear(h_sizes[k] -> h_sizes[k+1]);  out: Linear(h_sizes[-1] -> out_size).
    Stored as y = x @ W with:
      * layer 0 in-dim at TRUE width (matches unpadded x),
      * hidden/contraction dims zero-padded to LANE,
      * final layer out-dim at TRUE width (narrow output store).
    Weights bf16 [in, out]; biases f32 [1, out].
    """
    params = []
    dims = list(h_sizes) + [out_size]
    num_layers = len(dims) - 1
    for k in range(num_layers):
        d_in, d_out = dims[k], dims[k + 1]
        d_in_p = d_in if k == 0 else _round_up(d_in, LANE)
        d_out_p = d_out if k == num_layers - 1 else _round_up(d_out, LANE)
        key, wk, bk = jax.random.split(key, 3)
        bound = 1.0 / (d_in ** 0.5)
        w = jax.random.uniform(wk, (d_in, d_out), jnp.float32, -bound, bound)
        b = jax.random.uniform(bk, (1, d_out), jnp.float32, -bound, bound)
        w_p = (jnp.zeros((d_in_p, d_out_p), jnp.float32)
               .at[:d_in, :d_out].set(w).astype(jnp.bfloat16))
        b_p = jnp.zeros((1, d_out_p), jnp.float32).at[:, :d_out].set(b)
        params.append((w_p, b_p))
    return params


def mlp_forward(x, params):
    """Fused MLP forward: one pallas_call for the whole network."""
    batch, d_in = x.shape
    num_layers = len(params)
    out_size = params[-1][0].shape[1]

    # --- Batch tiling --------------------------------------------------
    # Multiples of 16 (bf16 packs two rows per sublane), large tiles to
    # amortize the ~0.35 us per-grid-step pipeline overhead, and >= 2 grid
    # steps when batch allows so v7x can shard the "parallel" axis across
    # both TensorCores.
    batch16 = _round_up(batch, 16)
    tm = min(TM_MAX, batch16)
    if batch16 // tm < 2 and batch16 >= 32:
        tm = _round_up(batch16 // 2, 16)
    batch_p = _round_up(batch, tm)

    # Pad only batch ROWS when needed (no feature-dim padding, no dtype cast
    # in the wrapper).  Padded rows compute bias-only junk that is sliced off.
    if batch_p != batch:
        x_in = jnp.zeros((batch_p, d_in), x.dtype).at[:batch].set(x)
    else:
        x_in = x

    # --- Specs ----------------------------------------------------------
    # x block: last dim == full array dim (legal even though < 128).
    in_specs = [pl.BlockSpec((tm, d_in), lambda i: (i, 0))]
    args = [x_in]
    for w, b in params:
        # Constant block index -> weights/biases DMA'd from HBM exactly once
        # per call and kept VMEM-resident across all batch tiles.
        in_specs.append(pl.BlockSpec(w.shape, lambda i: (0, 0)))
        in_specs.append(pl.BlockSpec(b.shape, lambda i: (0, 0)))
        args.append(w)
        args.append(b)

    kernel = functools.partial(_mlp_fused_kernel, num_layers=num_layers)
    out_p = pl.pallas_call(
        kernel,
        out_shape=jax.ShapeDtypeStruct((batch_p, out_size), jnp.float32),
        grid_spec=pl.GridSpec(
            grid=(batch_p // tm,),
            in_specs=in_specs,
            # Narrow (tm, out_size) output block: masked stores but 8x fewer
            # bytes than a 128-lane padded f32 slab -> wins in the mem-bound
            # regime this kernel lives in.
            out_specs=pl.BlockSpec((tm, out_size), lambda i: (i, 0)),
        ),
        compiler_params=pltpu.CompilerParams(
            dimension_semantics=("parallel",),
            vmem_limit_bytes=32 << 20,
        ),
    )(*args)
    return out_p[:batch] if batch_p != batch else out_p


if __name__ == "__main__":
    key = jax.random.PRNGKey(0)
    key, xkey = jax.random.split(key)

    # Small shapes consistent with the module: MLP(h_sizes=[32, 64, 32], out_size=16)
    h_sizes = [32, 64, 32]
    out_size = 16
    batch = 8

    x = jax.random.normal(xkey, (batch, h_sizes[0]), jnp.float32)
    params = init_mlp_params(key, h_sizes, out_size)

    out = mlp_forward(x, params)
    out = jax.block_until_ready(out)
    assert out.shape == (batch, out_size)

    # Reference with identical bf16-matmul / f32-accumulate semantics,
    # using the same (padded) stored parameters.
    ref_h = x.astype(jnp.bfloat16)
    ref = None
    for idx, (w, b) in enumerate(params):
        y = jnp.dot(ref_h, w, preferred_element_type=jnp.float32) + b
        if idx < len(params) - 1:
            ref_h = jnp.maximum(y, 0.0).astype(jnp.bfloat16)
        else:
            ref = y
    assert jnp.allclose(out, ref, atol=1e-3, rtol=1e-3), "bf16-consistent ref mismatch"

    # Coarse sanity check against pure-f32 math (same module semantics,
    # looser tolerance to absorb bf16 quantization).
    dims = h_sizes + [out_size]
    ref32 = x
    for idx, (w, b) in enumerate(params):
        d_i, d_o = dims[idx], dims[idx + 1]
        y = ref32 @ w[:d_i, :d_o].astype(jnp.float32) + b[:, :d_o]
        ref32 = jnp.maximum(y, 0.0) if idx < len(params) - 1 else y
    assert jnp.allclose(out, ref32, atol=5e-2, rtol=5e-2), "f32 semantic mismatch"

    print("KERNEL_OK")
</pallas_src>

<mosaic_0001>
module attributes {stable_mosaic.version = 11 : i64} {
  func.func @_mlp_fused_kernel(%arg0: i32, %arg1: memref<16x32xf32, #tpu.memory_space<vmem>>, %arg2: memref<32x128xbf16, #tpu.memory_space<vmem>>, %arg3: memref<1x128xf32, #tpu.memory_space<vmem>>, %arg4: memref<128x128xbf16, #tpu.memory_space<vmem>>, %arg5: memref<1x128xf32, #tpu.memory_space<vmem>>, %arg6: memref<128x16xbf16, #tpu.memory_space<vmem>>, %arg7: memref<1x16xf32, #tpu.memory_space<vmem>>, %arg8: memref<16x16xf32, #tpu.memory_space<vmem>>) attributes {dimension_semantics = [#tpu.dimension_semantics<parallel>], iteration_bounds = array<i64: 1>, scalar_prefetch = 0 : i64, scratch_operands = 0 : i64, tpu.core_type = #tpu.core_type<tc>, window_params = [{transform_indices = @transform_0, window_bounds = array<i64: 16, 32>}, {pipeline_mode = #tpu.pipeline_mode<synchronous>, transform_indices = @transform_1, window_bounds = array<i64: 32, 128>}, {pipeline_mode = #tpu.pipeline_mode<synchronous>, transform_indices = @transform_2, window_bounds = array<i64: 1, 128>}, {pipeline_mode = #tpu.pipeline_mode<synchronous>, transform_indices = @transform_3, window_bounds = array<i64: 128, 128>}, {pipeline_mode = #tpu.pipeline_mode<synchronous>, transform_indices = @transform_4, window_bounds = array<i64: 1, 128>}, {pipeline_mode = #tpu.pipeline_mode<synchronous>, transform_indices = @transform_5, window_bounds = array<i64: 128, 16>}, {pipeline_mode = #tpu.pipeline_mode<synchronous>, transform_indices = @transform_6, window_bounds = array<i64: 1, 16>}, {transform_indices = @transform_7, window_bounds = array<i64: 16, 16>}]} {
    %c0 = arith.constant 0 : index
    %c0_0 = arith.constant 0 : index
    %0 = vector.load %arg1[%c0, %c0_0] : memref<16x32xf32, #tpu.memory_space<vmem>>, vector<16x32xf32>
    %1 = arith.truncf %0 : vector<16x32xf32> to vector<16x32xbf16>
    %c0_1 = arith.constant 0 : index
    %c0_2 = arith.constant 0 : index
    %2 = vector.load %arg2[%c0_1, %c0_2] : memref<32x128xbf16, #tpu.memory_space<vmem>>, vector<32x128xbf16>
    %c0_3 = arith.constant 0 : index
    %c0_4 = arith.constant 0 : index
    %3 = vector.load %arg3[%c0_3, %c0_4] : memref<1x128xf32, #tpu.memory_space<vmem>>, vector<1x128xf32>
    %cst = arith.constant dense<0.000000e+00> : vector<16x128xf32>
    %4 = tpu.matmul %1, %2, %cst {dimension_numbers = #tpu.dot_dimension_numbers<[1], [0], [0], [1], [0, 0, 1, 1], [], []>} : vector<16x32xbf16>, vector<32x128xbf16>, vector<16x128xf32> -> vector<16x128xf32>
    %5 = vector.broadcast %3 : vector<1x128xf32> to vector<16x128xf32>
    %6 = arith.addf %4, %5 : vector<16x128xf32>
    %cst_5 = arith.constant 0.000000e+00 : f32
    %7 = vector.broadcast %cst_5 : f32 to vector<16x128xf32>
    %8 = arith.maximumf %6, %7 : vector<16x128xf32>
    %9 = arith.truncf %8 : vector<16x128xf32> to vector<16x128xbf16>
    %c0_6 = arith.constant 0 : index
    %c0_7 = arith.constant 0 : index
    %10 = vector.load %arg4[%c0_6, %c0_7] : memref<128x128xbf16, #tpu.memory_space<vmem>>, vector<128x128xbf16>
    %c0_8 = arith.constant 0 : index
    %c0_9 = arith.constant 0 : index
    %11 = vector.load %arg5[%c0_8, %c0_9] : memref<1x128xf32, #tpu.memory_space<vmem>>, vector<1x128xf32>
    %cst_10 = arith.constant dense<0.000000e+00> : vector<16x128xf32>
    %12 = tpu.matmul %9, %10, %cst_10 {dimension_numbers = #tpu.dot_dimension_numbers<[1], [0], [0], [1], [0, 0, 1, 1], [], []>} : vector<16x128xbf16>, vector<128x128xbf16>, vector<16x128xf32> -> vector<16x128xf32>
    %13 = vector.broadcast %11 : vector<1x128xf32> to vector<16x128xf32>
    %14 = arith.addf %12, %13 : vector<16x128xf32>
    %cst_11 = arith.constant 0.000000e+00 : f32
    %15 = vector.broadcast %cst_11 : f32 to vector<16x128xf32>
    %16 = arith.maximumf %14, %15 : vector<16x128xf32>
    %17 = arith.truncf %16 : vector<16x128xf32> to vector<16x128xbf16>
    %c0_12 = arith.constant 0 : index
    %c0_13 = arith.constant 0 : index
    %18 = vector.load %arg6[%c0_12, %c0_13] : memref<128x16xbf16, #tpu.memory_space<vmem>>, vector<128x16xbf16>
    %c0_14 = arith.constant 0 : index
    %c0_15 = arith.constant 0 : index
    %19 = vector.load %arg7[%c0_14, %c0_15] : memref<1x16xf32, #tpu.memory_space<vmem>>, vector<1x16xf32>
    %cst_16 = arith.constant dense<0.000000e+00> : vector<16x16xf32>
    %20 = tpu.matmul %17, %18, %cst_16 {dimension_numbers = #tpu.dot_dimension_numbers<[1], [0], [0], [1], [0, 0, 1, 1], [], []>} : vector<16x128xbf16>, vector<128x16xbf16>, vector<16x16xf32> -> vector<16x16xf32>
    %21 = vector.broadcast %19 : vector<1x16xf32> to vector<16x16xf32>
    %22 = arith.addf %20, %21 : vector<16x16xf32>
    %c0_17 = arith.constant 0 : index
    %c0_18 = arith.constant 0 : index
    %23 = vector.load %arg8[%c0_17, %c0_18] : memref<16x16xf32, #tpu.memory_space<vmem>>, vector<16x16xf32>
    tpu.vector_store %arg8[%c0_17, %c0_18], %22 {strides = array<i32>} : memref<16x16xf32, #tpu.memory_space<vmem>>, vector<16x16xf32>,
    return
  }
  func.func @transform_0(%arg0: i32) -> (i32, i32) {
    %c0_i32 = arith.constant 0 : i32
    %c0_i32_0 = arith.constant 0 : i32
    return %arg0, %c0_i32 : i32, i32
  }
  func.func @transform_1(%arg0: i32) -> (i32, i32) {
    %c0_i32 = arith.constant 0 : i32
    %c0_i32_0 = arith.constant 0 : i32
    %c0_i32_1 = arith.constant 0 : i32
    return %c0_i32, %c0_i32_0 : i32, i32
  }
  func.func @transform_2(%arg0: i32) -> (i32, i32) {
    %c0_i32 = arith.constant 0 : i32
    %c0_i32_0 = arith.constant 0 : i32
    %c0_i32_1 = arith.constant 0 : i32
    return %c0_i32, %c0_i32_0 : i32, i32
  }
  func.func @transform_3(%arg0: i32) -> (i32, i32) {
    %c0_i32 = arith.constant 0 : i32
    %c0_i32_0 = arith.constant 0 : i32
    %c0_i32_1 = arith.constant 0 : i32
    return %c0_i32, %c0_i32_0 : i32, i32
  }
  func.func @transform_4(%arg0: i32) -> (i32, i32) {
    %c0_i32 = arith.constant 0 : i32
    %c0_i32_0 = arith.constant 0 : i32
    %c0_i32_1 = arith.constant 0 : i32
    return %c0_i32, %c0_i32_0 : i32, i32
  }
  func.func @transform_5(%arg0: i32) -> (i32, i32) {
    %c0_i32 = arith.constant 0 : i32
    %c0_i32_0 = arith.constant 0 : i32
    %c0_i32_1 = arith.constant 0 : i32
    return %c0_i32, %c0_i32_0 : i32, i32
  }
  func.func @transform_6(%arg0: i32) -> (i32, i32) {
    %c0_i32 = arith.constant 0 : i32
    %c0_i32_0 = arith.constant 0 : i32
    %c0_i32_1 = arith.constant 0 : i32
    return %c0_i32, %c0_i32_0 : i32, i32
  }
  func.func @transform_7(%arg0: i32) -> (i32, i32) {
    %c0_i32 = arith.constant 0 : i32
    %c0_i32_0 = arith.constant 0 : i32
    return %arg0, %c0_i32 : i32, i32
  }
}

</mosaic_0001>

<bundles_post_ra>
// kernel: tpu_custom_call.1
= control target key start
LH: loop header
LB: loop body
LE: loop exit
PB: predicated region body
PF: predicated region fallthrough
CT: control target
= control target key end

     0   :  { %12 = vsyncpa [#allocation3], 0  ;;  %s592_s0 = inlined_call_operand.hbm [shape: f32[16,32], index: 0, kind: input, shape index: {}]   ;;  %s593_s1 = inlined_call_operand.hbm [shape: bf16[32,128], index: 1, kind: input, shape index: {}]   ;;  %s594_s2 = inlined_call_operand.vmem [shape: f32[1,128], index: 2, kind: input, shape index: {}]   ;;  %s595_s3 = inlined_call_operand.vmem [shape: bf16[128,128], index: 3, kind: input, shape index: {}]   ;;  %s596_s4 = inlined_call_operand.vmem [shape: f32[1,128], index: 4, kind: input, shape index: {}]   ;;  %s597_s5 = inlined_call_operand.vmem [shape: bf16[128,16], index: 5, kind: input, shape index: {}]   ;;  %s598_s6 = inlined_call_operand.vmem [shape: f32[1,16], index: 6, kind: input, shape index: {}]   ;;  %s599_s7 = inlined_call_operand.hbm [shape: f32[16,16], index: 7, kind: output, shape index: {}]  }
   0x1   :  { %13 = vsyncpa [#allocation6], 0 }
   0x2   :  { %14 = vsyncpa [#allocation4], 0  ;;  %s19_s26 = sshll.u32 %s592_s0, 4  ;;  %s473_s27 = smov [#allocation2]   ;;  %s20_s26 = int_to_ptr.hbm [resolvable:$true] %s19_s26 }
   0x3   :  { %s21_s28 = sshll.u32 %s473_s27, 4  ;;  %s32_s8 = sshll.u32 %s593_s1, 4  ;;  %s22_s28 = int_to_ptr.vmem [resolvable:$true] %s21_s28  ;;  %s33_s8 = int_to_ptr.hbm [resolvable:$true] %s32_s8 }
   0x4   :  { %s474_s9 = smov 128   ;;  %s475_s10 = smov 8  }
   0x5   :  { %27 = dma.hbm_to_vmem [thread:$0]  %s20_s26, 256, %s22_s28, [#allocation3], %s474_s9, %s474_s9, %s475_s10  }
   0x6   :  { %s476_s11 = smov [#allocation5]   ;;  %s477_s13 = smov 64  }
   0x7   :  { %s34_s12 = sshll.u32 %s476_s11, 4  ;;  %s478_s0 = smov 4   ;;  %s35_s12 = int_to_ptr.vmem [resolvable:$true] %s34_s12 }
   0x8   :  { %40 = dma.hbm_to_vmem [thread:$0]  %s33_s8, 256, %s35_s12, [#allocation6], %s477_s13, %s477_s13, %s478_s0  }
   0x9   :  { %467 = dma.done.wait [#allocation3], 256  }
   0xa   :  { %468 = vsyncadd [#allocation3], 4294967040 }
   0xb   :  { %469 = dma.done.wait [#allocation6], 256  }
   0xc   :  { %470 = vsyncadd [#allocation6], 4294967040  ;;  %v368_v0 = vld [vmem:[#allocation5 + $0x8] sm:$0xff]  ;;  %v367_v1 = vld [vmem:[#allocation5] sm:$0xff]  ;;  %vm83_vm0 = vcmask 261120   ;;  %vm271_vm1 = vcmask 130048  }
   0xd   :  { %v376_v2 = vld [vmem:[%s595_s3 + $0x38] sm:$0xff]  ;;  %93 = vmatpush.bf16.msra.mxu0 %v368_v0  ;;  %v60_v3 = vld [vmem:[#allocation2] sm:$0xff]  ;;  %v61_v4 = vld [vmem:[#allocation2 + $0x8] sm:$0xff] }
   0xe   :  { %172 = vmatpush.bf16.msra.mxu1 %v376_v2  ;;  %v375_v5 = vld [vmem:[%s595_s3 + $0x30] sm:$0xff]  ;;  %v62_v6 = vpack.c.bf16 %v61_v4, %v60_v3  ;;  %v374_v7 = vld [vmem:[%s595_s3 + $0x28] sm:$0xff]  ;;  %v373_v8 = vld [vmem:[%s595_s3 + $0x20] sm:$0xff] }
   0xf   :  { %v372_v9 = vld [vmem:[%s595_s3 + $0x18] sm:$0xff]  ;;  %v371_v10 = vld [vmem:[%s595_s3 + $0x10] sm:$0xff]  ;;  %v370_v11 = vld [vmem:[%s595_s3 + $0x8] sm:$0xff] }
  0x10   :  { %v369_v12 = vld [vmem:[%s595_s3] sm:$0xff]  ;;  %v384_v13 = vld [vmem:[%s597_s5 + $0x38] sm:$0xff]  ;;  %v383_v14 = vld [vmem:[%s597_s5 + $0x30] sm:$0xff] }
  0x11   :  { %94 = vmatpush.bf16.msra.mxu0 %v367_v1  ;;  %257 = vmatpush.bf16.msra.mxu2 %v384_v13  ;;  %v382_v15 = vld [vmem:[%s597_s5 + $0x28] sm:$0xff]  ;;  %v381_v16 = vld [vmem:[%s597_s5 + $0x20] sm:$0xff]  ;;  %v380_v25 = vld [vmem:[%s597_s5 + $0x18] sm:$0xff] }
  0x12   :  { %173 = vmatpush.bf16.msra.mxu1 %v375_v5  ;;  %v392_v18 = vld [vmem:[%s594_s2] ss:$0 sm:$0xff]  ;;  %v379_v26 = vld [vmem:[%s597_s5 + $0x10] sm:$0xff]  ;;  %v378_v27 = vld [vmem:[%s597_s5 + $0x8] sm:$0xff] }
  0x13   :  { %v377_v28 = vld [vmem:[%s597_s5] sm:$0xff]  ;;  %s479_s5 = smov [#allocation7]  }
  0x14   :  { %302 = vmatmul.msk.bf16.vlgmr.msra.gmra.mxu0 %vm83_vm0, %v62_v6  ;;  %v393_v30 = vld [vmem:[%s596_s4] ss:$0 sm:$0xff]  ;;  %s278_s26 = sshll.u32 %s479_s5, 4  ;;  %s280_s4 = sshll.u32 %s599_s7, 4  ;;  %s279_s26 = int_to_ptr.vmem [resolvable:$true] %s278_s26  ;;  %s281_s4 = int_to_ptr.hbm [resolvable:$true] %s280_s4 }
  0x15   :  { %258 = vmatpush.bf16.msra.mxu2 %v383_v14  ;;  %v394_v37 = vld [vmem:[%s598_s6] ss:$0 sm:$0xff] }
  0x16   :  { %174 = vmatpush.bf16.msra.mxu1 %v374_v7 }
  0x19   :  { %259 = vmatpush.bf16.msra.mxu2 %v382_v15 }
  0x1a   :  { %175 = vmatpush.bf16.msra.mxu1 %v373_v8 }
  0x1d   :  { %260 = vmatpush.bf16.msra.mxu2 %v381_v16 }
  0x1e   :  { %176 = vmatpush.bf16.msra.mxu1 %v372_v9 }
  0x21   :  { %261 = vmatpush.bf16.msra.mxu2 %v380_v25 }
  0x22   :  { %177 = vmatpush.bf16.msra.mxu1 %v371_v10 }
  0x25   :  { %262 = vmatpush.bf16.msra.mxu2 %v379_v26 }
  0x26   :  { %178 = vmatpush.bf16.msra.mxu1 %v370_v11 }
  0x29   :  { %263 = vmatpush.bf16.msra.mxu2 %v378_v27 }
  0x2a   :  { %179 = vmatpush.bf16.msra.mxu1 %v369_v12 }
  0x2d   :  { %264 = vmatpush.bf16.msra.mxu2 %v377_v28 }
  0x91   :  { %v96_v17 = vpop.f32.mrf.mxu0 }
  0x92   :  { %v97_v19 = vadd.f32 %v392_v18, %v96_v17 }
  0x94   :  { %v101_v22 = vmax.f32 %v97_v19, 0.0 }
  0x99   :  { %v98_v20 = vpop.f32.mrf.mxu0 }
  0x9a   :  { %v99_v21 = vadd.f32 %v392_v18, %v98_v20 }
  0x9c   :  { %v102_v23 = vmax.f32 %v99_v21, 0.0 }
  0x9e   :  { %v103_v24 = vpack.c.bf16 %v102_v23, %v101_v22 }
  0xa0   :  { %180 = vmatmul.bf16.vlgmr.msra.gmra.mxu1 %v103_v24 }
 0x11d   :  { %v181_v29 = vpop.f32.mrf.mxu1 }
 0x11e   :  { %v182_v31 = vadd.f32 %v393_v30, %v181_v29 }
 0x120   :  { %v186_v34 = vmax.f32 %v182_v31, 0.0 }
 0x125   :  { %v183_v32 = vpop.f32.mrf.mxu1 }
 0x126   :  { %v184_v33 = vadd.f32 %v393_v30, %v183_v32 }
 0x128   :  { %v187_v35 = vmax.f32 %v184_v33, 0.0 }
 0x12a   :  { %v188_v36 = vpack.c.bf16 %v187_v35, %v186_v34 }
 0x12c   :  { %265 = vmatmul.bf16.vlgmr.msra.gmra.mxu2 %v188_v36 }
 0x1af   :  { %v266_v38 = vpop.f32.mrf.mxu2 }
 0x1b0   :  { %v267_v39 = vadd.f32 %v394_v37, %v266_v38 }
 0x1b2   :  { %272 = vst.msk [vmem:[#allocation7] sm:$0xff] %vm271_vm1, %v267_v39 }
 0x1b7   :  { %v268_v40 = vpop.f32.mrf.mxu2 }
 0x1b8   :  { %v269_v41 = vadd.f32 %v394_v37, %v268_v40 }
 0x1ba   :  { %273 = vst.msk [vmem:[#allocation7 + $0x8] sm:$0xff] %vm271_vm1, %v269_v41 }
 0x1bb   :  { %286 = dma.vmem_to_hbm [thread:$0]  %s279_s26, 256, %s281_s4, [#allocation4], %s474_s9, %s474_s9, %s475_s10  }
 0x1bc   :  { %471 = dma.done.wait [#allocation4], 256  }
 0x1bd   :  { %472 = vsyncadd [#allocation4], 4294967040 }
 0x1be   :  { %291 = vsyncpa [#allocation3], 1 }
 0x1bf   :  { %292 = vsyncpa [#allocation6], 1 }
 0x1c0   :  { %293 = vsyncpa [#allocation4], 1 }

</bundles_post_ra>
